<compile_context>
chip_gen: v7x
topology: tpu7x:2x2x1
jax: 0.10.0
libtpu: 0.0.40
codegen_flags: <defaults>
</compile_context>

<pallas_src>
import functools

import jax
import jax.numpy as jnp
from jax.experimental import pallas as pl
from jax.experimental.pallas import tpu as pltpu

_LANE = 128  # vreg lane width


def _max_block_rows() -> int:
    # Generation-aware block sizing (best effort; safe fallback).
    #   v7x      : 4096 rows -> 2 MiB/plane; in+out double-buffered = 8 MiB,
    #              under the 32 MiB scoped default; amortizes per-step overhead
    #              at 3.2 TB/s HBM.
    #   v5e/v6e  : 2048 rows -> 4 MiB double-buffered, under v5e's 16 MiB
    #              scoped default; already on the roofline plateau.
    try:
        kind = jax.devices()[0].device_kind.lower()
    except Exception:  # pragma: no cover - defensive
        kind = ""
    return 4096 if "v7" in kind else 2048


def _complex_act_kernel(x_ref, o_ref, *, act_fn):
    # Single lane-dense elementwise pass; VPU/EUP work hides under the DMA.
    o_ref[...] = act_fn(x_ref[...])


def complex_act(z: jax.Array, act_fn) -> jax.Array:
    """Pallas equivalent of ComplexAct(act)(z) for a complex input z."""
    assert jnp.issubdtype(z.dtype, jnp.complexfloating), "input must be complex"
    orig_shape = z.shape
    real_dtype = jnp.real(z).dtype

    # Split + stack fuses into one XLA read-side fusion producing the slab.
    # TODO(synk): complex128 inputs are computed in float32 (TPU has no f64
    # vector path); output dtype is preserved but precision is not.
    planes = jnp.stack(
        [jnp.real(z).reshape(-1), jnp.imag(z).reshape(-1)]
    ).astype(jnp.float32)                                    # (2, n)

    n = z.size
    rows = pl.cdiv(n, _LANE)           # rows per plane
    pad = rows * _LANE - n             # nonzero only when n % 128 != 0
    if pad:
        planes = jnp.pad(planes, ((0, 0), (0, pad)))
    total_rows = 2 * rows
    slab = planes.reshape(total_rows, _LANE)   # contiguous reshape: free

    # block_rows is either the full extent (always legal) or a multiple of 8.
    block_rows = min(_max_block_rows(), total_rows)
    grid = (pl.cdiv(total_rows, block_rows),)  # partial last block is clipped

    blk = pl.BlockSpec((block_rows, _LANE), lambda i: (i, 0))
    kernel = functools.partial(_complex_act_kernel, act_fn=act_fn)

    out = pl.pallas_call(
        kernel,
        out_shape=jax.ShapeDtypeStruct((total_rows, _LANE), jnp.float32),
        grid_spec=pltpu.PrefetchScalarGridSpec(
            num_scalar_prefetch=0,
            grid=grid,
            in_specs=[blk],
            out_specs=blk,
        ),
        # In-place on the intermediate slab: no extra output allocation.
        input_output_aliases={0: 0},
        compiler_params=pltpu.CompilerParams(
            dimension_semantics=("parallel",),
        ),
    )(slab)

    out = out.reshape(2, rows * _LANE)
    if pad:
        out = out[:, :n]
    out_re = out[0].reshape(orig_shape).astype(real_dtype)
    out_im = out[1].reshape(orig_shape).astype(real_dtype)
    # Single fused recombine (cheaper than out_re + 1j * out_im).
    # NOTE: the split/pad/recombine glue still costs ~2 extra HBM passes; if
    # the surrounding model can consume/produce split float planes directly,
    # feed those to the pallas_call instead of a complex array.
    return jax.lax.complex(out_re, out_im)


if __name__ == "__main__":
    # NOTE: torch.nn.GELU defaults to exact erf; jax.nn.gelu defaults to the
    # tanh approximation.  ComplexAct is activation-agnostic and the check
    # below is self-consistent (same act_fn in kernel and reference).
    act_fn = jax.nn.gelu

    key = jax.random.PRNGKey(0)
    k_re, k_im = jax.random.split(key)

    # Small NCHW-like complex input: batch=2, channels=4, spatial=16x16.
    shape = (2, 4, 16, 16)
    re = jax.random.normal(k_re, shape, dtype=jnp.float32)
    im = jax.random.normal(k_im, shape, dtype=jnp.float32)
    z = jax.lax.complex(re, im)                      # complex64

    complex_act_fn = jax.jit(functools.partial(complex_act, act_fn=act_fn))
    out = jax.block_until_ready(complex_act_fn(z))

    ref = act_fn(re) + 1j * act_fn(im)
    assert out.shape == z.shape and out.dtype == jnp.complex64
    assert jnp.allclose(jnp.real(out), jnp.real(ref), atol=1e-5, rtol=1e-5)
    assert jnp.allclose(jnp.imag(out), jnp.imag(ref), atol=1e-5, rtol=1e-5)

    # Also exercise the non-128-aligned (padding) path.
    shape2 = (3, 5, 7)
    re2 = jax.random.normal(k_re, shape2, dtype=jnp.float32)
    im2 = jax.random.normal(k_im, shape2, dtype=jnp.float32)
    z2 = jax.lax.complex(re2, im2)
    out2 = jax.block_until_ready(
        jax.jit(functools.partial(complex_act, act_fn=act_fn))(z2)
    )
    ref2 = act_fn(re2) + 1j * act_fn(im2)
    assert out2.shape == z2.shape and out2.dtype == jnp.complex64
    assert jnp.allclose(jnp.real(out2), jnp.real(ref2), atol=1e-5, rtol=1e-5)
    assert jnp.allclose(jnp.imag(out2), jnp.imag(ref2), atol=1e-5, rtol=1e-5)

    print("KERNEL_OK")
</pallas_src>

<mosaic_0001>
module attributes {stable_mosaic.version = 11 : i64} {
  func.func @_complex_act_kernel(%arg0: i32, %arg1: memref<32x128xf32, #tpu.memory_space<vmem>>, %arg2: memref<32x128xf32, #tpu.memory_space<vmem>>) attributes {dimension_semantics = [#tpu.dimension_semantics<parallel>], iteration_bounds = array<i64: 1>, scalar_prefetch = 0 : i64, scratch_operands = 0 : i64, tpu.core_type = #tpu.core_type<tc>, window_params = [{transform_indices = @transform_0, window_bounds = array<i64: 32, 128>}, {transform_indices = @transform_1, window_bounds = array<i64: 32, 128>}]} {
    %c0 = arith.constant 0 : index
    %c0_0 = arith.constant 0 : index
    %0 = vector.load %arg1[%c0, %c0_0] : memref<32x128xf32, #tpu.memory_space<vmem>>, vector<32x128xf32>
    %1 = arith.mulf %0, %0 : vector<32x128xf32>
    %2 = arith.mulf %0, %1 : vector<32x128xf32>
    %cst = arith.constant 4.471500e-02 : f32
    %3 = vector.broadcast %cst : f32 to vector<32x128xf32>
    %4 = arith.mulf %3, %2 : vector<32x128xf32>
    %5 = arith.addf %0, %4 : vector<32x128xf32>
    %cst_1 = arith.constant 0.797884583 : f32
    %6 = vector.broadcast %cst_1 : f32 to vector<32x128xf32>
    %7 = arith.mulf %6, %5 : vector<32x128xf32>
    %8 = math.tanh %7 : vector<32x128xf32>
    %cst_2 = arith.constant 1.000000e+00 : f32
    %9 = vector.broadcast %cst_2 : f32 to vector<32x128xf32>
    %10 = arith.addf %9, %8 : vector<32x128xf32>
    %cst_3 = arith.constant 5.000000e-01 : f32
    %11 = vector.broadcast %cst_3 : f32 to vector<32x128xf32>
    %12 = arith.mulf %11, %10 : vector<32x128xf32>
    %13 = arith.mulf %0, %12 : vector<32x128xf32>
    %c0_4 = arith.constant 0 : index
    %c0_5 = arith.constant 0 : index
    %14 = vector.load %arg2[%c0_4, %c0_5] : memref<32x128xf32, #tpu.memory_space<vmem>>, vector<32x128xf32>
    tpu.vector_store %arg2[%c0_4, %c0_5], %13 {strides = array<i32>} : memref<32x128xf32, #tpu.memory_space<vmem>>, vector<32x128xf32>,
    return
  }
  func.func @transform_0(%arg0: i32) -> (i32, i32) {
    %c0_i32 = arith.constant 0 : i32
    %c0_i32_0 = arith.constant 0 : i32
    return %arg0, %c0_i32 : i32, i32
  }
  func.func @transform_1(%arg0: i32) -> (i32, i32) {
    %c0_i32 = arith.constant 0 : i32
    %c0_i32_0 = arith.constant 0 : i32
    return %arg0, %c0_i32 : i32, i32
  }
}

</mosaic_0001>

<bundles_post_ra>
// kernel: custom-call.1
= control target key start
LH: loop header
LB: loop body
LE: loop exit
PB: predicated region body
PF: predicated region fallthrough
CT: control target
= control target key end

     0   :  { %s59_s0 = inlined_call_operand.hbm [shape: c64[2,4,16,16], index: 0, kind: input, shape index: {}]   ;;  %s60_s1 = inlined_call_operand.vmem [shape: f32[2,4,16,16], index: 1, kind: output, shape index: {}]  }
   0x1   :  { %s2_s8 = scalar_lea.hbm %s59_s0, 2048 }
   0x2   :  { %3 = vsyncpa [#allocation0], 0  ;;  %s4_s11 = sshll.u32 %s60_s1, 4  ;;  %s34_s14 = scalar_lea.hbm %s59_s0, 4096  ;;  %s5_s11 = int_to_ptr.vmem [resolvable:$true] %s4_s11 }
   0x3   :  { %p11_p0 = scmp.ne.s32.totalorder %s2_s8, %s34_s14  ;;  %p13_p1 = scmp.lt.u32.totalorder %s2_s8, %s59_s0 }
   0x4   :  { %p14_p2 = scmp.lt.u32.totalorder %s34_s14, %s34_s14  ;;  %p16_p4 = scmp.lt.u32.totalorder %s34_s14, %s2_s8 }
   0x6   :  { %p15_p3 = por %p14_p2, %p13_p1 }
   0x8   :  { %p17_p5 = por %p16_p4, %p15_p3 }
   0xa   :  { %p18_p6 = pnand %p17_p5, %p11_p0 }
   0xc   :  { %21 = shalt.err (!%p18_p6)  }
   0xd   :  { %s22_s17 = scalar_lea.vmem %s5_s11, 2048  ;;  %p27_p8 = scmp.lt.s32.totalorder %s5_s11, %s5_s11 }
   0xe   :  { %p23_p7 = scmp.ne.s32.totalorder %s5_s11, %s22_s17  ;;  %p28_p9 = scmp.lt.s32.totalorder %s22_s17, %s22_s17 }
  0x10   :  { %p29_p10 = por %p28_p9, %p27_p8 }
  0x12   :  { %p30_p11 = pnand %p29_p10, %p23_p7 }
  0x14   :  { %33 = shalt.err (!%p30_p11)  }
  0x15   :  { %7 = dma.hbm_to_vmem [thread:$0]  %s2_s8, 2048, %s5_s11, [#allocation0] }
  0x16   :  { %35 = dma.done.wait [#allocation0], 2048  }
  0x17   :  { %36 = vsyncadd [#allocation0], 4294965248 }
  0x18   :  { %9 = vsyncpa [#allocation0], 1 }

// kernel: custom-call
= control target key start
LH: loop header
LB: loop body
LE: loop exit
PB: predicated region body
PF: predicated region fallthrough
CT: control target
= control target key end

     0   :  { %2 = vsyncpa [#allocation0], 0  ;;  %s61_s0 = inlined_call_operand.hbm [shape: c64[2,4,16,16], index: 0, kind: input, shape index: {}]   ;;  %s62_s1 = inlined_call_operand.vmem [shape: f32[2,4,16,16], index: 1, kind: output, shape index: {}]  }
   0x1   :  { %s3_s8 = sshll.u32 %s62_s1, 4  ;;  %s9_s11 = scalar_lea.hbm %s61_s0, 2048  ;;  %s4_s8 = int_to_ptr.vmem [resolvable:$true] %s3_s8 }
   0x2   :  { %p10_p0 = scmp.ne.s32.totalorder %s61_s0, %s9_s11  ;;  %s11_s16 = scalar_lea.hbm %s61_s0, 4096 }
   0x3   :  { %p12_p1 = scmp.lt.u32.totalorder %s11_s16, %s9_s11  ;;  %p13_p2 = scmp.lt.u32.totalorder %s9_s11, %s61_s0 }
   0x5   :  { %p14_p3 = por %p13_p2, %p12_p1 }
   0x7   :  { %p15_p4 = pnand %p14_p3, %p10_p0 }
   0x9   :  { %18 = shalt.err (!%p15_p4)  }
   0xa   :  { %s19_s1 = scalar_lea.vmem %s4_s8, 2048  ;;  %p24_p6 = scmp.lt.s32.totalorder %s4_s8, %s4_s8 }
   0xb   :  { %p20_p5 = scmp.ne.s32.totalorder %s4_s8, %s19_s1  ;;  %p25_p7 = scmp.lt.s32.totalorder %s19_s1, %s19_s1 }
   0xd   :  { %p26_p8 = por %p25_p7, %p24_p6 }
   0xf   :  { %p27_p9 = pnand %p26_p8, %p20_p5 }
  0x11   :  { %30 = shalt.err (!%p27_p9)  }
  0x12   :  { %6 = dma.hbm_to_vmem [thread:$0]  %s61_s0, 2048, %s4_s8, [#allocation0] }
  0x13   :  { %31 = dma.done.wait [#allocation0], 2048  }
  0x14   :  { %32 = vsyncadd [#allocation0], 4294965248 }
  0x15   :  { %8 = vsyncpa [#allocation0], 1 }

// kernel: squeeze.3
= control target key start
LH: loop header
LB: loop body
LE: loop exit
PB: predicated region body
PF: predicated region fallthrough
CT: control target
= control target key end

     0   :  { %vm3_vm0 = vcmask 130048   ;;  %s178_s10 = smov 112   ;;  %s179_s19 = smov 80   ;;  %s328_s0 = inlined_call_operand.vmem [shape: f32[2048], index: 0, kind: input, shape index: {}]   ;;  %s329_s1 = inlined_call_operand.vmem [shape: f32[2,4,16,16], index: 1, kind: output, shape index: {}]  }
   0x1   :  { %v30_v0 = vld [vmem:[%s328_s0] sm:$0xff]   ;;  %v142_v1 = vld [vmem:[%s328_s0 + $0x8] sm:$0xff]   ;;  %s177_s0 = smov 96   ;;  %s180_s20 = smov 64  }
   0x2   :  { %31 = vrot.lane.b32.xlu1 %v30_v0, %s177_s0  ;;  %14 = vrot.lane.b32.xlu0 %v30_v0, %s178_s10  ;;  %4 = vst.msk [vmem:[%s329_s1] ss:$8 sm:$0xf] %vm3_vm0, %v30_v0   ;;  %5 = vst.msk [vmem:[%s329_s1] ss:$8 sm:$0xf0] %vm3_vm0, %v30_v0  }
   0x3   :  { %133 = vst.msk [vmem:[%s329_s1 + $0x40] ss:$8 sm:$0xf] %vm3_vm0, %v142_v1   ;;  %134 = vst.msk [vmem:[%s329_s1 + $0x40] ss:$8 sm:$0xf0] %vm3_vm0, %v142_v1  }
   0x4   :  { %s181_s21 = smov 48   ;;  %s182_s22 = smov 32  }
   0x5   :  { %s183_s23 = smov 16  }
   0x6   :  { %40 = vrot.lane.b32.xlu1 %v142_v1, %s177_s0  ;;  %23 = vrot.lane.b32.xlu0 %v142_v1, %s178_s10 }
   0xa   :  { %57 = vrot.lane.b32.xlu1 %v142_v1, %s179_s19  ;;  %48 = vrot.lane.b32.xlu0 %v30_v0, %s179_s19 }
   0xe   :  { %74 = vrot.lane.b32.xlu1 %v142_v1, %s180_s20  ;;  %65 = vrot.lane.b32.xlu0 %v30_v0, %s180_s20 }
  0x12   :  { %91 = vrot.lane.b32.xlu1 %v142_v1, %s181_s21  ;;  %82 = vrot.lane.b32.xlu0 %v30_v0, %s181_s21 }
  0x16   :  { %108 = vrot.lane.b32.xlu1 %v142_v1, %s182_s22  ;;  %99 = vrot.lane.b32.xlu0 %v30_v0, %s182_s22 }
  0x1a   :  { %125 = vrot.lane.b32.xlu1 %v142_v1, %s183_s23  ;;  %116 = vrot.lane.b32.xlu0 %v30_v0, %s183_s23 }
  0x74   :  { %v32_v2 = vpop.permute.xlu1 %31   ;;  %v15_v3 = vpop.permute.xlu0 %14  }
  0x75   :  { %140 = vst.msk [vmem:[%s329_s1 + $0x2] ss:$8 sm:$0xf] %vm3_vm0, %v32_v2   ;;  %141 = vst.msk [vmem:[%s329_s1 + $0x2] ss:$8 sm:$0xf0] %vm3_vm0, %v32_v2  }
  0x76   :  { %135 = vst.msk [vmem:[%s329_s1 + $0x1] ss:$8 sm:$0xf] %vm3_vm0, %v15_v3   ;;  %136 = vst.msk [vmem:[%s329_s1 + $0x1] ss:$8 sm:$0xf0] %vm3_vm0, %v15_v3  }
  0x78   :  { %v41_v4 = vpop.permute.xlu1 %40   ;;  %v24_v5 = vpop.permute.xlu0 %23  }
  0x79   :  { %143 = vst.msk [vmem:[%s329_s1 + $0x42] ss:$8 sm:$0xf] %vm3_vm0, %v41_v4   ;;  %144 = vst.msk [vmem:[%s329_s1 + $0x42] ss:$8 sm:$0xf0] %vm3_vm0, %v41_v4  }
  0x7a   :  { %138 = vst.msk [vmem:[%s329_s1 + $0x41] ss:$8 sm:$0xf] %vm3_vm0, %v24_v5   ;;  %139 = vst.msk [vmem:[%s329_s1 + $0x41] ss:$8 sm:$0xf0] %vm3_vm0, %v24_v5  }
  0x7c   :  { %v58_v6 = vpop.permute.xlu1 %57   ;;  %v49_v7 = vpop.permute.xlu0 %48  }
  0x7d   :  { %148 = vst.msk [vmem:[%s329_s1 + $0x43] ss:$8 sm:$0xf] %vm3_vm0, %v58_v6   ;;  %149 = vst.msk [vmem:[%s329_s1 + $0x43] ss:$8 sm:$0xf0] %vm3_vm0, %v58_v6  }
  0x7e   :  { %145 = vst.msk [vmem:[%s329_s1 + $0x3] ss:$8 sm:$0xf] %vm3_vm0, %v49_v7   ;;  %146 = vst.msk [vmem:[%s329_s1 + $0x3] ss:$8 sm:$0xf0] %vm3_vm0, %v49_v7  }
  0x80   :  { %v75_v8 = vpop.permute.xlu1 %74   ;;  %v66_v9 = vpop.permute.xlu0 %65  }
  0x81   :  { %153 = vst.msk [vmem:[%s329_s1 + $0x44] ss:$8 sm:$0xf] %vm3_vm0, %v75_v8   ;;  %154 = vst.msk [vmem:[%s329_s1 + $0x44] ss:$8 sm:$0xf0] %vm3_vm0, %v75_v8  }
  0x82   :  { %150 = vst.msk [vmem:[%s329_s1 + $0x4] ss:$8 sm:$0xf] %vm3_vm0, %v66_v9   ;;  %151 = vst.msk [vmem:[%s329_s1 + $0x4] ss:$8 sm:$0xf0] %vm3_vm0, %v66_v9  }
  0x84   :  { %v92_v10 = vpop.permute.xlu1 %91   ;;  %v83_v11 = vpop.permute.xlu0 %82  }
  0x85   :  { %158 = vst.msk [vmem:[%s329_s1 + $0x45] ss:$8 sm:$0xf] %vm3_vm0, %v92_v10   ;;  %159 = vst.msk [vmem:[%s329_s1 + $0x45] ss:$8 sm:$0xf0] %vm3_vm0, %v92_v10  }
  0x86   :  { %155 = vst.msk [vmem:[%s329_s1 + $0x5] ss:$8 sm:$0xf] %vm3_vm0, %v83_v11   ;;  %156 = vst.msk [vmem:[%s329_s1 + $0x5] ss:$8 sm:$0xf0] %vm3_vm0, %v83_v11  }
  0x88   :  { %v109_v12 = vpop.permute.xlu1 %108   ;;  %v100_v13 = vpop.permute.xlu0 %99  }
  0x89   :  { %163 = vst.msk [vmem:[%s329_s1 + $0x46] ss:$8 sm:$0xf] %vm3_vm0, %v109_v12   ;;  %164 = vst.msk [vmem:[%s329_s1 + $0x46] ss:$8 sm:$0xf0] %vm3_vm0, %v109_v12  }
  0x8a   :  { %160 = vst.msk [vmem:[%s329_s1 + $0x6] ss:$8 sm:$0xf] %vm3_vm0, %v100_v13   ;;  %161 = vst.msk [vmem:[%s329_s1 + $0x6] ss:$8 sm:$0xf0] %vm3_vm0, %v100_v13  }
  0x8c   :  { %v126_v14 = vpop.permute.xlu1 %125   ;;  %v117_v15 = vpop.permute.xlu0 %116  }
  0x8d   :  { %168 = vst.msk [vmem:[%s329_s1 + $0x47] ss:$8 sm:$0xf] %vm3_vm0, %v126_v14   ;;  %169 = vst.msk [vmem:[%s329_s1 + $0x47] ss:$8 sm:$0xf0] %vm3_vm0, %v126_v14  }
  0x8e   :  { %165 = vst.msk [vmem:[%s329_s1 + $0x7] ss:$8 sm:$0xf] %vm3_vm0, %v117_v15   ;;  %166 = vst.msk [vmem:[%s329_s1 + $0x7] ss:$8 sm:$0xf0] %vm3_vm0, %v117_v15  }

// kernel: squeeze.2
= control target key start
LH: loop header
LB: loop body
LE: loop exit
PB: predicated region body
PF: predicated region fallthrough
CT: control target
= control target key end

     0   :  { %vm3_vm0 = vcmask 130048   ;;  %s178_s10 = smov 112   ;;  %s179_s19 = smov 80   ;;  %s328_s0 = inlined_call_operand.vmem [shape: f32[16,128], index: 0, kind: input, shape index: {}]   ;;  %s329_s1 = inlined_call_operand.vmem [shape: f32[2,4,16,16], index: 1, kind: output, shape index: {}]  }
   0x1   :  { %v30_v0 = vld [vmem:[%s328_s0] sm:$0xff]   ;;  %v142_v1 = vld [vmem:[%s328_s0 + $0x8] sm:$0xff]   ;;  %s177_s0 = smov 96   ;;  %s180_s20 = smov 64  }
   0x2   :  { %31 = vrot.lane.b32.xlu1 %v30_v0, %s177_s0  ;;  %14 = vrot.lane.b32.xlu0 %v30_v0, %s178_s10  ;;  %4 = vst.msk [vmem:[%s329_s1] ss:$8 sm:$0xf] %vm3_vm0, %v30_v0   ;;  %5 = vst.msk [vmem:[%s329_s1] ss:$8 sm:$0xf0] %vm3_vm0, %v30_v0  }
   0x3   :  { %133 = vst.msk [vmem:[%s329_s1 + $0x40] ss:$8 sm:$0xf] %vm3_vm0, %v142_v1   ;;  %134 = vst.msk [vmem:[%s329_s1 + $0x40] ss:$8 sm:$0xf0] %vm3_vm0, %v142_v1  }
   0x4   :  { %s181_s21 = smov 48   ;;  %s182_s22 = smov 32  }
   0x5   :  { %s183_s23 = smov 16  }
   0x6   :  { %40 = vrot.lane.b32.xlu1 %v142_v1, %s177_s0  ;;  %23 = vrot.lane.b32.xlu0 %v142_v1, %s178_s10 }
   0xa   :  { %57 = vrot.lane.b32.xlu1 %v142_v1, %s179_s19  ;;  %48 = vrot.lane.b32.xlu0 %v30_v0, %s179_s19 }
   0xe   :  { %74 = vrot.lane.b32.xlu1 %v142_v1, %s180_s20  ;;  %65 = vrot.lane.b32.xlu0 %v30_v0, %s180_s20 }
  0x12   :  { %91 = vrot.lane.b32.xlu1 %v142_v1, %s181_s21  ;;  %82 = vrot.lane.b32.xlu0 %v30_v0, %s181_s21 }
  0x16   :  { %108 = vrot.lane.b32.xlu1 %v142_v1, %s182_s22  ;;  %99 = vrot.lane.b32.xlu0 %v30_v0, %s182_s22 }
  0x1a   :  { %125 = vrot.lane.b32.xlu1 %v142_v1, %s183_s23  ;;  %116 = vrot.lane.b32.xlu0 %v30_v0, %s183_s23 }
  0x74   :  { %v32_v2 = vpop.permute.xlu1 %31   ;;  %v15_v3 = vpop.permute.xlu0 %14  }
  0x75   :  { %140 = vst.msk [vmem:[%s329_s1 + $0x2] ss:$8 sm:$0xf] %vm3_vm0, %v32_v2   ;;  %141 = vst.msk [vmem:[%s329_s1 + $0x2] ss:$8 sm:$0xf0] %vm3_vm0, %v32_v2  }
  0x76   :  { %135 = vst.msk [vmem:[%s329_s1 + $0x1] ss:$8 sm:$0xf] %vm3_vm0, %v15_v3   ;;  %136 = vst.msk [vmem:[%s329_s1 + $0x1] ss:$8 sm:$0xf0] %vm3_vm0, %v15_v3  }
  0x78   :  { %v41_v4 = vpop.permute.xlu1 %40   ;;  %v24_v5 = vpop.permute.xlu0 %23  }
  0x79   :  { %143 = vst.msk [vmem:[%s329_s1 + $0x42] ss:$8 sm:$0xf] %vm3_vm0, %v41_v4   ;;  %144 = vst.msk [vmem:[%s329_s1 + $0x42] ss:$8 sm:$0xf0] %vm3_vm0, %v41_v4  }
  0x7a   :  { %138 = vst.msk [vmem:[%s329_s1 + $0x41] ss:$8 sm:$0xf] %vm3_vm0, %v24_v5   ;;  %139 = vst.msk [vmem:[%s329_s1 + $0x41] ss:$8 sm:$0xf0] %vm3_vm0, %v24_v5  }
  0x7c   :  { %v58_v6 = vpop.permute.xlu1 %57   ;;  %v49_v7 = vpop.permute.xlu0 %48  }
  0x7d   :  { %148 = vst.msk [vmem:[%s329_s1 + $0x43] ss:$8 sm:$0xf] %vm3_vm0, %v58_v6   ;;  %149 = vst.msk [vmem:[%s329_s1 + $0x43] ss:$8 sm:$0xf0] %vm3_vm0, %v58_v6  }
  0x7e   :  { %145 = vst.msk [vmem:[%s329_s1 + $0x3] ss:$8 sm:$0xf] %vm3_vm0, %v49_v7   ;;  %146 = vst.msk [vmem:[%s329_s1 + $0x3] ss:$8 sm:$0xf0] %vm3_vm0, %v49_v7  }
  0x80   :  { %v75_v8 = vpop.permute.xlu1 %74   ;;  %v66_v9 = vpop.permute.xlu0 %65  }
  0x81   :  { %153 = vst.msk [vmem:[%s329_s1 + $0x44] ss:$8 sm:$0xf] %vm3_vm0, %v75_v8   ;;  %154 = vst.msk [vmem:[%s329_s1 + $0x44] ss:$8 sm:$0xf0] %vm3_vm0, %v75_v8  }
  0x82   :  { %150 = vst.msk [vmem:[%s329_s1 + $0x4] ss:$8 sm:$0xf] %vm3_vm0, %v66_v9   ;;  %151 = vst.msk [vmem:[%s329_s1 + $0x4] ss:$8 sm:$0xf0] %vm3_vm0, %v66_v9  }
  0x84   :  { %v92_v10 = vpop.permute.xlu1 %91   ;;  %v83_v11 = vpop.permute.xlu0 %82  }
  0x85   :  { %158 = vst.msk [vmem:[%s329_s1 + $0x45] ss:$8 sm:$0xf] %vm3_vm0, %v92_v10   ;;  %159 = vst.msk [vmem:[%s329_s1 + $0x45] ss:$8 sm:$0xf0] %vm3_vm0, %v92_v10  }
  0x86   :  { %155 = vst.msk [vmem:[%s329_s1 + $0x5] ss:$8 sm:$0xf] %vm3_vm0, %v83_v11   ;;  %156 = vst.msk [vmem:[%s329_s1 + $0x5] ss:$8 sm:$0xf0] %vm3_vm0, %v83_v11  }
  0x88   :  { %v109_v12 = vpop.permute.xlu1 %108   ;;  %v100_v13 = vpop.permute.xlu0 %99  }
  0x89   :  { %163 = vst.msk [vmem:[%s329_s1 + $0x46] ss:$8 sm:$0xf] %vm3_vm0, %v109_v12   ;;  %164 = vst.msk [vmem:[%s329_s1 + $0x46] ss:$8 sm:$0xf0] %vm3_vm0, %v109_v12  }
  0x8a   :  { %160 = vst.msk [vmem:[%s329_s1 + $0x6] ss:$8 sm:$0xf] %vm3_vm0, %v100_v13   ;;  %161 = vst.msk [vmem:[%s329_s1 + $0x6] ss:$8 sm:$0xf0] %vm3_vm0, %v100_v13  }
  0x8c   :  { %v126_v14 = vpop.permute.xlu1 %125   ;;  %v117_v15 = vpop.permute.xlu0 %116  }
  0x8d   :  { %168 = vst.msk [vmem:[%s329_s1 + $0x47] ss:$8 sm:$0xf] %vm3_vm0, %v126_v14   ;;  %169 = vst.msk [vmem:[%s329_s1 + $0x47] ss:$8 sm:$0xf0] %vm3_vm0, %v126_v14  }
  0x8e   :  { %165 = vst.msk [vmem:[%s329_s1 + $0x7] ss:$8 sm:$0xf] %vm3_vm0, %v117_v15   ;;  %166 = vst.msk [vmem:[%s329_s1 + $0x7] ss:$8 sm:$0xf0] %vm3_vm0, %v117_v15  }

// kernel: custom-call.2
= control target key start
LH: loop header
LB: loop body
LE: loop exit
PB: predicated region body
PF: predicated region fallthrough
CT: control target
= control target key end

     0   :  { %s126_s0 = inlined_call_operand.vmem [shape: f32[2,4,16,16], index: 0, kind: input, shape index: {}]   ;;  %s127_s1 = inlined_call_operand.vmem [shape: f32[2,4,16,16], index: 1, kind: input, shape index: {}]   ;;  %s128_s2 = inlined_call_operand.hbm [shape: c64[2,4,16,16], index: 2, kind: output, shape index: {}]  }
   0x1   :  { %s87_s11 = scalar_lea.hbm %s128_s2, 2048 }
   0x2   :  { %4 = vsyncpa [#allocation0], 0  ;;  %s5_s14 = sshll.u32 %s126_s0, 4  ;;  %s6_s14 = int_to_ptr.vmem [resolvable:$true] %s5_s14 }
   0x3   :  { %s18_s15 = scalar_lea.vmem %s6_s14, 2048  ;;  %p23_p1 = scmp.lt.s32.totalorder %s6_s14, %s6_s14 }
   0x4   :  { %p19_p0 = scmp.ne.s32.totalorder %s6_s14, %s18_s15  ;;  %p24_p2 = scmp.lt.s32.totalorder %s18_s15, %s18_s15 }
   0x6   :  { %p25_p3 = por %p24_p2, %p23_p1 }
   0x8   :  { %p26_p4 = pnand %p25_p3, %p19_p0 }
   0xa   :  { %29 = shalt.err (!%p26_p4)  }
   0xb   :  { %p31_p5 = scmp.ne.s32.totalorder %s128_s2, %s87_s11  ;;  %s32_s0 = scalar_lea.hbm %s128_s2, 4096 }
   0xc   :  { %p33_p6 = scmp.lt.u32.totalorder %s32_s0, %s87_s11  ;;  %p34_p7 = scmp.lt.u32.totalorder %s87_s11, %s128_s2 }
   0xe   :  { %p35_p8 = por %p34_p7, %p33_p6 }
  0x10   :  { %p36_p9 = pnand %p35_p8, %p31_p5 }
  0x12   :  { %39 = shalt.err (!%p36_p9)  }
  0x13   :  { %8 = dma.vmem_to_hbm [thread:$0]  %s6_s14, 2048, %s128_s2, [#allocation0] }
  0x14   :  { %65 = dma.done.wait [#allocation0], 2048  }
  0x15   :  { %66 = vsyncadd [#allocation0], 4294965248 }
  0x16   :  { %10 = vsyncpa [#allocation0], 1 }
  0x17   :  { %11 = vsyncpa [#allocation1], 0  ;;  %s12_s28 = sshll.u32 %s127_s1, 4  ;;  %s13_s28 = int_to_ptr.vmem [resolvable:$true] %s12_s28 }
  0x18   :  { %s40_s29 = scalar_lea.vmem %s13_s28, 2048  ;;  %p45_p11 = scmp.lt.s32.totalorder %s13_s28, %s13_s28 }
  0x19   :  { %p41_p10 = scmp.ne.s32.totalorder %s13_s28, %s40_s29  ;;  %p46_p12 = scmp.lt.s32.totalorder %s40_s29, %s40_s29 }
  0x1b   :  { %p47_p13 = por %p46_p12, %p45_p11 }
  0x1d   :  { %p48_p0 = pnand %p47_p13, %p41_p10 }
  0x1f   :  { %51 = shalt.err (!%p48_p0)  }
  0x20   :  { %p53_p1 = scmp.ne.s32.totalorder %s87_s11, %s32_s0  ;;  %p56_p2 = scmp.lt.u32.totalorder %s32_s0, %s32_s0 }
  0x22   :  { %p57_p3 = por %p56_p2, %p34_p7 }
  0x24   :  { %p59_p4 = por %p57_p3, %p33_p6 }
  0x26   :  { %p60_p5 = pnand %p59_p4, %p53_p1 }
  0x28   :  { %63 = shalt.err (!%p60_p5)  }
  0x29   :  { %15 = dma.vmem_to_hbm [thread:$0]  %s13_s28, 2048, %s87_s11, [#allocation1] }
  0x2a   :  { %67 = dma.done.wait [#allocation1], 2048  }
  0x2b   :  { %68 = vsyncadd [#allocation1], 4294965248 }
  0x2c   :  { %17 = vsyncpa [#allocation1], 1 }

// kernel: complex_act.1
= control target key start
LH: loop header
LB: loop body
LE: loop exit
PB: predicated region body
PF: predicated region fallthrough
CT: control target
= control target key end

     0   :  { %s98_s0 = inlined_call_operand.vmem [shape: f32[32,128], index: 0, kind: input, shape index: {}, may-alias: {0,1}]   ;;  %s99_s1 = inlined_call_operand.vmem [shape: f32[32,128], index: 1, kind: output, shape index: {}, may-alias: {0,1}]  }
   0x1   :  { %v8_v0 = vld [vmem:[%s98_s0] sm:$0xff]  ;;  %v9_v1 = vld [vmem:[%s98_s0 + $0x8] sm:$0xff]  ;;  %v10_v2 = vld [vmem:[%s98_s0 + $0x10] sm:$0xff] }
   0x2   :  { %v12_v3 = vmul.f32 %v8_v0, %v8_v0  ;;  %v13_v4 = vmul.f32 %v9_v1, %v9_v1  ;;  %v14_v5 = vmul.f32 %v10_v2, %v10_v2  ;;  %v11_v6 = vld [vmem:[%s98_s0 + $0x18] sm:$0xff] }
   0x3   :  { %v15_v7 = vmul.f32 %v11_v6, %v11_v6 }
   0x4   :  { %v16_v8 = vmul.f32 %v12_v3, %v8_v0  ;;  %v17_v9 = vmul.f32 %v13_v4, %v9_v1  ;;  %v18_v10 = vmul.f32 %v14_v5, %v10_v2 }
   0x5   :  { %v19_v11 = vmul.f32 %v15_v7, %v11_v6 }
   0x6   :  { %v20_v12 = vmul.f32 0.044715, %v16_v8  ;;  %v21_v13 = vmul.f32 0.044715, %v17_v9  ;;  %v22_v14 = vmul.f32 0.044715, %v18_v10 }
   0x7   :  { %v23_v15 = vmul.f32 0.044715, %v19_v11 }
   0x8   :  { %v24_v16 = vadd.f32 %v20_v12, %v8_v0  ;;  %v25_v17 = vadd.f32 %v21_v13, %v9_v1  ;;  %v26_v18 = vadd.f32 %v22_v14, %v10_v2 }
   0x9   :  { %v27_v19 = vadd.f32 %v23_v15, %v11_v6 }
   0xa   :  { %v28_v20 = vmul.f32 0.7978846, %v24_v16  ;;  %v29_v21 = vmul.f32 0.7978846, %v25_v17  ;;  %v30_v22 = vmul.f32 0.7978846, %v26_v18 }
   0xb   :  { %v31_v23 = vmul.f32 0.7978846, %v27_v19 }
   0xc   :  { %56 = vtanh.f32 %v28_v20 }
   0xd   :  { %58 = vtanh.f32 %v29_v21 }
   0xe   :  { %60 = vtanh.f32 %v30_v22 }
   0xf   :  { %62 = vtanh.f32 %v31_v23 }
  0x16   :  { %v57_v24 = vpop.eup %56 }
  0x17   :  { %v59_v25 = vpop.eup %58  ;;  %v36_v26 = vadd.f32 1.0, %v57_v24 }
  0x18   :  { %v61_v27 = vpop.eup %60  ;;  %v37_v28 = vadd.f32 1.0, %v59_v25 }
  0x19   :  { %v63_v29 = vpop.eup %62  ;;  %v40_v30 = vmul.f32 0.5, %v36_v26  ;;  %v38_v31 = vadd.f32 1.0, %v61_v27 }
  0x1a   :  { %v41_v32 = vmul.f32 0.5, %v37_v28  ;;  %v39_v33 = vadd.f32 1.0, %v63_v29 }
  0x1b   :  { %v44_v34 = vmul.f32 %v40_v30, %v8_v0  ;;  %v42_v35 = vmul.f32 0.5, %v38_v31 }
  0x1c   :  { %v45_v36 = vmul.f32 %v41_v32, %v9_v1  ;;  %v43_v37 = vmul.f32 0.5, %v39_v33 }
  0x1d   :  { %48 = vst [vmem:[%s99_s1] sm:$0xff] %v44_v34  ;;  %v46_v38 = vmul.f32 %v42_v35, %v10_v2 }
  0x1e   :  { %49 = vst [vmem:[%s99_s1 + $0x8] sm:$0xff] %v45_v36  ;;  %v47_v39 = vmul.f32 %v43_v37, %v11_v6 }
  0x1f   :  { %50 = vst [vmem:[%s99_s1 + $0x10] sm:$0xff] %v46_v38 }
  0x20   :  { %51 = vst [vmem:[%s99_s1 + $0x18] sm:$0xff] %v47_v39 }

</bundles_post_ra>
